<compile_context>
chip_gen: v7x
topology: tpu7x:2x2x1
jax: 0.10.0
libtpu: 0.0.40
codegen_flags: <defaults>
</compile_context>

<pallas_src>
import functools

import jax
import jax.numpy as jnp
from jax import lax
from jax.experimental import pallas as pl
from jax.experimental.pallas import tpu as pltpu

# "config" constants implied by the module (small, deterministic)
FILTERS = 4       # c.filters
BOARD = 8         # c.board_size  -> H = W = 8
BATCH = 2
BN_EPS = 1e-5     # PyTorch BatchNorm2d default eps
# TODO(synk): BatchNorm2d running-stat (momentum) updates are training-time state and do not
#             affect the forward output; they are not modeled here.


def _policy_head_kernel(x_ref, wc_ref, bc_ref, gamma_ref, beta_ref,
                        w0_ref, w1_ref, bl_ref, o_ref, *, c_in):
    # x_ref:  [B, C_in, HW]  (VMEM)  lane axis = HW (lane-dense)
    # wc_ref: [2, C_in]      (SMEM)  1x1 conv weights (scalars)
    # bc/gamma/beta: [2]     (SMEM)  conv bias / BN gamma / BN beta (scalars)
    # w0/w1:  [HW, HW]       (VMEM)  per-output-channel split of the linear weight (transposed)
    # bl_ref: [1, HW]        (VMEM)  linear bias
    # o_ref:  [B, HW]        (VMEM)  softmax policy
    xc = [x_ref[:, c, :] for c in range(c_in)]          # each [B, HW]

    zs = []
    for co in range(2):
        # 1x1 conv on the VPU: scalar-broadcast multiply-adds (no MXU pass for K=4).
        acc = xc[0] * wc_ref[co, 0]
        for c in range(1, c_in):
            acc = acc + xc[c] * wc_ref[co, c]
        z = acc + bc_ref[co]
        # BatchNorm2d training mode: per-channel batch mean / biased variance over (B, H, W),
        # i.e. over every element of z.
        m = jnp.mean(z, axis=(0, 1), keepdims=True)
        v = jnp.mean((z - m) ** 2, axis=(0, 1), keepdims=True)
        zs.append(gamma_ref[co] * (z - m) * lax.rsqrt(v + BN_EPS) + beta_ref[co])

    # Linear layer; the (c, h, w) flatten is folded into the per-channel weight split.
    logits = (jnp.dot(zs[0], w0_ref[...], preferred_element_type=jnp.float32)
              + jnp.dot(zs[1], w1_ref[...], preferred_element_type=jnp.float32)
              + bl_ref[...])

    # Softmax(dim=1), max-subtracted.
    mx = jnp.max(logits, axis=-1, keepdims=True)
    e = jnp.exp(logits - mx)
    o_ref[...] = e / jnp.sum(e, axis=-1, keepdims=True)


def policy_head(x, params):
    """x: [B, C, H, W] (NCHW, float32). Returns softmax policy [B, H*W]."""
    wc, bc, gamma, beta, wl, bl = params
    B, C, H, W = x.shape
    HW = H * W

    x3 = x.reshape(B, C, HW).astype(jnp.float32)        # pure reshape of NCHW, no transpose
    wc2 = wc[:, :, 0, 0].astype(jnp.float32)            # [2, C_in]
    wl3 = wl.reshape(HW, 2, HW)
    w0 = wl3[:, 0, :].T                                 # [HW, HW] multiplies channel-0 block
    w1 = wl3[:, 1, :].T                                 # [HW, HW] multiplies channel-1 block
    bl2 = bl.reshape(1, HW)

    vmem = pl.BlockSpec(memory_space=pltpu.MemorySpace.VMEM)
    smem = pl.BlockSpec(memory_space=pltpu.MemorySpace.SMEM)

    kernel = functools.partial(_policy_head_kernel, c_in=C)
    return pl.pallas_call(
        kernel,
        out_shape=jax.ShapeDtypeStruct((B, HW), jnp.float32),
        in_specs=[vmem, smem, smem, smem, smem, vmem, vmem, vmem],
        out_specs=vmem,
    )(x3, wc2, bc.astype(jnp.float32), gamma.astype(jnp.float32),
      beta.astype(jnp.float32), w0, w1, bl2)


def policy_head_ref(x, params):
    """Pure-JAX reference of the PyTorch forward pass (training-mode BN)."""
    wc, bc, gamma, beta, wl, bl = params
    B, C, H, W = x.shape
    HW = H * W
    # 1x1 conv (NCHW)
    z = jnp.einsum("bchw,oc->bohw", x, wc[:, :, 0, 0]) + bc[None, :, None, None]
    # BatchNorm2d training-mode (batch stats over B,H,W; biased variance)
    mean = jnp.mean(z, axis=(0, 2, 3), keepdims=True)
    var = jnp.mean((z - mean) ** 2, axis=(0, 2, 3), keepdims=True)
    z = gamma[None, :, None, None] * (z - mean) / jnp.sqrt(var + BN_EPS) + beta[None, :, None, None]
    # flatten like .view(-1, 2*H*W)  (c, h, w order)
    flat = z.reshape(B, 2 * HW)
    logits = flat @ wl.T + bl
    return jax.nn.softmax(logits, axis=1)


def init_params(key):
    k = jax.random.split(key, 6)
    wc = 0.1 * jax.random.normal(k[0], (2, FILTERS, 1, 1), jnp.float32)                  # conv weight
    bc = 0.1 * jax.random.normal(k[1], (2,), jnp.float32)                                # conv bias
    gamma = 1.0 + 0.1 * jax.random.normal(k[2], (2,), jnp.float32)                       # bn weight
    beta = 0.1 * jax.random.normal(k[3], (2,), jnp.float32)                              # bn bias
    wl = 0.1 * jax.random.normal(k[4], (BOARD * BOARD, BOARD * BOARD * 2), jnp.float32)  # linear weight
    bl = 0.1 * jax.random.normal(k[5], (BOARD * BOARD,), jnp.float32)                    # linear bias
    return (wc, bc, gamma, beta, wl, bl)


if __name__ == "__main__":
    key = jax.random.PRNGKey(0)
    kx, kp = jax.random.split(key)
    x = jax.random.normal(kx, (BATCH, FILTERS, BOARD, BOARD), jnp.float32)
    params = init_params(kp)

    out = jax.block_until_ready(policy_head(x, params))

    ref = policy_head_ref(x, params)
    assert out.shape == (BATCH, BOARD * BOARD)
    assert jnp.allclose(out, ref, atol=1e-5, rtol=1e-5), "mismatch vs reference"
    assert jnp.allclose(jnp.sum(out, axis=1), jnp.ones((BATCH,)), atol=1e-5)

    print("KERNEL_OK")
</pallas_src>

<mosaic_0001>
module attributes {stable_mosaic.version = 11 : i64} {
  func.func @_policy_head_kernel(%arg0: memref<2x4x64xf32, #tpu.memory_space<vmem>>, %arg1: memref<2x4xf32, #tpu.memory_space<smem>>, %arg2: memref<2xf32, #tpu.memory_space<smem>>, %arg3: memref<2xf32, #tpu.memory_space<smem>>, %arg4: memref<2xf32, #tpu.memory_space<smem>>, %arg5: memref<64x64xf32, #tpu.memory_space<vmem>>, %arg6: memref<64x64xf32, #tpu.memory_space<vmem>>, %arg7: memref<1x64xf32, #tpu.memory_space<vmem>>, %arg8: memref<2x64xf32, #tpu.memory_space<vmem>>) attributes {dimension_semantics = [], scalar_prefetch = 0 : i64, scratch_operands = 0 : i64, tpu.core_type = #tpu.core_type<tc>} {
    %c0 = arith.constant 0 : index
    %c0_0 = arith.constant 0 : index
    %c0_1 = arith.constant 0 : index
    %0 = vector.load %arg0[%c0, %c0_0, %c0_1] : memref<2x4x64xf32, #tpu.memory_space<vmem>>, vector<2x1x64xf32>
    %1 = vector.shape_cast %0 : vector<2x1x64xf32> to vector<2x64xf32>
    %c0_2 = arith.constant 0 : index
    %c1 = arith.constant 1 : index
    %c0_3 = arith.constant 0 : index
    %2 = vector.load %arg0[%c0_2, %c1, %c0_3] : memref<2x4x64xf32, #tpu.memory_space<vmem>>, vector<2x1x64xf32>
    %3 = vector.shape_cast %2 : vector<2x1x64xf32> to vector<2x64xf32>
    %c0_4 = arith.constant 0 : index
    %c2 = arith.constant 2 : index
    %c0_5 = arith.constant 0 : index
    %4 = vector.load %arg0[%c0_4, %c2, %c0_5] : memref<2x4x64xf32, #tpu.memory_space<vmem>>, vector<2x1x64xf32>
    %5 = vector.shape_cast %4 : vector<2x1x64xf32> to vector<2x64xf32>
    %c0_6 = arith.constant 0 : index
    %c3 = arith.constant 3 : index
    %c0_7 = arith.constant 0 : index
    %6 = vector.load %arg0[%c0_6, %c3, %c0_7] : memref<2x4x64xf32, #tpu.memory_space<vmem>>, vector<2x1x64xf32>
    %7 = vector.shape_cast %6 : vector<2x1x64xf32> to vector<2x64xf32>
    %c0_8 = arith.constant 0 : index
    %c0_9 = arith.constant 0 : index
    %8 = memref.load %arg1[%c0_8, %c0_9] : memref<2x4xf32, #tpu.memory_space<smem>>
    %9 = vector.broadcast %8 : f32 to vector<2x64xf32>
    %10 = arith.mulf %1, %9 : vector<2x64xf32>
    %c0_10 = arith.constant 0 : index
    %c1_11 = arith.constant 1 : index
    %11 = memref.load %arg1[%c0_10, %c1_11] : memref<2x4xf32, #tpu.memory_space<smem>>
    %12 = vector.broadcast %11 : f32 to vector<2x64xf32>
    %13 = arith.mulf %3, %12 : vector<2x64xf32>
    %14 = arith.addf %10, %13 : vector<2x64xf32>
    %c0_12 = arith.constant 0 : index
    %c2_13 = arith.constant 2 : index
    %15 = memref.load %arg1[%c0_12, %c2_13] : memref<2x4xf32, #tpu.memory_space<smem>>
    %16 = vector.broadcast %15 : f32 to vector<2x64xf32>
    %17 = arith.mulf %5, %16 : vector<2x64xf32>
    %18 = arith.addf %14, %17 : vector<2x64xf32>
    %c0_14 = arith.constant 0 : index
    %c3_15 = arith.constant 3 : index
    %19 = memref.load %arg1[%c0_14, %c3_15] : memref<2x4xf32, #tpu.memory_space<smem>>
    %20 = vector.broadcast %19 : f32 to vector<2x64xf32>
    %21 = arith.mulf %7, %20 : vector<2x64xf32>
    %22 = arith.addf %18, %21 : vector<2x64xf32>
    %c0_16 = arith.constant 0 : index
    %23 = memref.load %arg2[%c0_16] : memref<2xf32, #tpu.memory_space<smem>>
    %24 = vector.broadcast %23 : f32 to vector<2x64xf32>
    %25 = arith.addf %22, %24 : vector<2x64xf32>
    %26 = vector.shape_cast %25 : vector<2x64xf32> to vector<1x2x64xf32>
    %cst = arith.constant dense<0.000000e+00> : vector<1xf32>
    %27 = vector.multi_reduction <add>, %26, %cst [1, 2] : vector<1x2x64xf32> to vector<1xf32>
    %28 = vector.shape_cast %27 : vector<1xf32> to vector<1x1x1xf32>
    %29 = vector.extract %28[0, 0, 0] : f32 from vector<1x1x1xf32>
    %30 = vector.broadcast %29 : f32 to vector<1x1xf32>
    %cst_17 = arith.constant 1.280000e+02 : f32
    %31 = vector.broadcast %cst_17 : f32 to vector<1x1xf32>
    %32 = arith.divf %30, %31 : vector<1x1xf32>
    %33 = vector.broadcast %32 : vector<1x1xf32> to vector<2x64xf32>
    %34 = arith.subf %25, %33 : vector<2x64xf32>
    %35 = arith.mulf %34, %34 : vector<2x64xf32>
    %36 = vector.shape_cast %35 : vector<2x64xf32> to vector<1x2x64xf32>
    %cst_18 = arith.constant dense<0.000000e+00> : vector<1xf32>
    %37 = vector.multi_reduction <add>, %36, %cst_18 [1, 2] : vector<1x2x64xf32> to vector<1xf32>
    %38 = vector.shape_cast %37 : vector<1xf32> to vector<1x1x1xf32>
    %39 = vector.extract %38[0, 0, 0] : f32 from vector<1x1x1xf32>
    %40 = vector.broadcast %39 : f32 to vector<1x1xf32>
    %cst_19 = arith.constant 1.280000e+02 : f32
    %41 = vector.broadcast %cst_19 : f32 to vector<1x1xf32>
    %42 = arith.divf %40, %41 : vector<1x1xf32>
    %c0_20 = arith.constant 0 : index
    %43 = memref.load %arg3[%c0_20] : memref<2xf32, #tpu.memory_space<smem>>
    %44 = vector.broadcast %32 : vector<1x1xf32> to vector<2x64xf32>
    %45 = arith.subf %25, %44 : vector<2x64xf32>
    %46 = vector.broadcast %43 : f32 to vector<2x64xf32>
    %47 = arith.mulf %46, %45 : vector<2x64xf32>
    %cst_21 = arith.constant 9.99999974E-6 : f32
    %48 = vector.broadcast %cst_21 : f32 to vector<1x1xf32>
    %49 = arith.addf %42, %48 : vector<1x1xf32>
    %50 = math.rsqrt %49 : vector<1x1xf32>
    %51 = vector.broadcast %50 : vector<1x1xf32> to vector<2x64xf32>
    %52 = arith.mulf %47, %51 : vector<2x64xf32>
    %c0_22 = arith.constant 0 : index
    %53 = memref.load %arg4[%c0_22] : memref<2xf32, #tpu.memory_space<smem>>
    %54 = vector.broadcast %53 : f32 to vector<2x64xf32>
    %55 = arith.addf %52, %54 : vector<2x64xf32>
    %c1_23 = arith.constant 1 : index
    %c0_24 = arith.constant 0 : index
    %56 = memref.load %arg1[%c1_23, %c0_24] : memref<2x4xf32, #tpu.memory_space<smem>>
    %57 = vector.broadcast %56 : f32 to vector<2x64xf32>
    %58 = arith.mulf %1, %57 : vector<2x64xf32>
    %c1_25 = arith.constant 1 : index
    %c1_26 = arith.constant 1 : index
    %59 = memref.load %arg1[%c1_25, %c1_26] : memref<2x4xf32, #tpu.memory_space<smem>>
    %60 = vector.broadcast %59 : f32 to vector<2x64xf32>
    %61 = arith.mulf %3, %60 : vector<2x64xf32>
    %62 = arith.addf %58, %61 : vector<2x64xf32>
    %c1_27 = arith.constant 1 : index
    %c2_28 = arith.constant 2 : index
    %63 = memref.load %arg1[%c1_27, %c2_28] : memref<2x4xf32, #tpu.memory_space<smem>>
    %64 = vector.broadcast %63 : f32 to vector<2x64xf32>
    %65 = arith.mulf %5, %64 : vector<2x64xf32>
    %66 = arith.addf %62, %65 : vector<2x64xf32>
    %c1_29 = arith.constant 1 : index
    %c3_30 = arith.constant 3 : index
    %67 = memref.load %arg1[%c1_29, %c3_30] : memref<2x4xf32, #tpu.memory_space<smem>>
    %68 = vector.broadcast %67 : f32 to vector<2x64xf32>
    %69 = arith.mulf %7, %68 : vector<2x64xf32>
    %70 = arith.addf %66, %69 : vector<2x64xf32>
    %c1_31 = arith.constant 1 : index
    %71 = memref.load %arg2[%c1_31] : memref<2xf32, #tpu.memory_space<smem>>
    %72 = vector.broadcast %71 : f32 to vector<2x64xf32>
    %73 = arith.addf %70, %72 : vector<2x64xf32>
    %74 = vector.shape_cast %73 : vector<2x64xf32> to vector<1x2x64xf32>
    %cst_32 = arith.constant dense<0.000000e+00> : vector<1xf32>
    %75 = vector.multi_reduction <add>, %74, %cst_32 [1, 2] : vector<1x2x64xf32> to vector<1xf32>
    %76 = vector.shape_cast %75 : vector<1xf32> to vector<1x1x1xf32>
    %77 = vector.extract %76[0, 0, 0] : f32 from vector<1x1x1xf32>
    %78 = vector.broadcast %77 : f32 to vector<1x1xf32>
    %cst_33 = arith.constant 1.280000e+02 : f32
    %79 = vector.broadcast %cst_33 : f32 to vector<1x1xf32>
    %80 = arith.divf %78, %79 : vector<1x1xf32>
    %81 = vector.broadcast %80 : vector<1x1xf32> to vector<2x64xf32>
    %82 = arith.subf %73, %81 : vector<2x64xf32>
    %83 = arith.mulf %82, %82 : vector<2x64xf32>
    %84 = vector.shape_cast %83 : vector<2x64xf32> to vector<1x2x64xf32>
    %cst_34 = arith.constant dense<0.000000e+00> : vector<1xf32>
    %85 = vector.multi_reduction <add>, %84, %cst_34 [1, 2] : vector<1x2x64xf32> to vector<1xf32>
    %86 = vector.shape_cast %85 : vector<1xf32> to vector<1x1x1xf32>
    %87 = vector.extract %86[0, 0, 0] : f32 from vector<1x1x1xf32>
    %88 = vector.broadcast %87 : f32 to vector<1x1xf32>
    %cst_35 = arith.constant 1.280000e+02 : f32
    %89 = vector.broadcast %cst_35 : f32 to vector<1x1xf32>
    %90 = arith.divf %88, %89 : vector<1x1xf32>
    %c1_36 = arith.constant 1 : index
    %91 = memref.load %arg3[%c1_36] : memref<2xf32, #tpu.memory_space<smem>>
    %92 = vector.broadcast %80 : vector<1x1xf32> to vector<2x64xf32>
    %93 = arith.subf %73, %92 : vector<2x64xf32>
    %94 = vector.broadcast %91 : f32 to vector<2x64xf32>
    %95 = arith.mulf %94, %93 : vector<2x64xf32>
    %cst_37 = arith.constant 9.99999974E-6 : f32
    %96 = vector.broadcast %cst_37 : f32 to vector<1x1xf32>
    %97 = arith.addf %90, %96 : vector<1x1xf32>
    %98 = math.rsqrt %97 : vector<1x1xf32>
    %99 = vector.broadcast %98 : vector<1x1xf32> to vector<2x64xf32>
    %100 = arith.mulf %95, %99 : vector<2x64xf32>
    %c1_38 = arith.constant 1 : index
    %101 = memref.load %arg4[%c1_38] : memref<2xf32, #tpu.memory_space<smem>>
    %102 = vector.broadcast %101 : f32 to vector<2x64xf32>
    %103 = arith.addf %100, %102 : vector<2x64xf32>
    %c0_39 = arith.constant 0 : index
    %c0_40 = arith.constant 0 : index
    %104 = vector.load %arg5[%c0_39, %c0_40] : memref<64x64xf32, #tpu.memory_space<vmem>>, vector<64x64xf32>
    %cst_41 = arith.constant dense<0.000000e+00> : vector<2x64xf32>
    %105 = tpu.matmul %55, %104, %cst_41 {dimension_numbers = #tpu.dot_dimension_numbers<[1], [0], [0], [1], [0, 0, 1, 1], [], []>} : vector<2x64xf32>, vector<64x64xf32>, vector<2x64xf32> -> vector<2x64xf32>
    %c0_42 = arith.constant 0 : index
    %c0_43 = arith.constant 0 : index
    %106 = vector.load %arg6[%c0_42, %c0_43] : memref<64x64xf32, #tpu.memory_space<vmem>>, vector<64x64xf32>
    %cst_44 = arith.constant dense<0.000000e+00> : vector<2x64xf32>
    %107 = tpu.matmul %103, %106, %cst_44 {dimension_numbers = #tpu.dot_dimension_numbers<[1], [0], [0], [1], [0, 0, 1, 1], [], []>} : vector<2x64xf32>, vector<64x64xf32>, vector<2x64xf32> -> vector<2x64xf32>
    %108 = arith.addf %105, %107 : vector<2x64xf32>
    %c0_45 = arith.constant 0 : index
    %c0_46 = arith.constant 0 : index
    %109 = vector.load %arg7[%c0_45, %c0_46] : memref<1x64xf32, #tpu.memory_space<vmem>>, vector<1x64xf32>
    %110 = vector.broadcast %109 : vector<1x64xf32> to vector<2x64xf32>
    %111 = arith.addf %108, %110 : vector<2x64xf32>
    %cst_47 = arith.constant dense<0xFF800000> : vector<2xf32>
    %112 = vector.multi_reduction <maximumf>, %111, %cst_47 [1] : vector<2x64xf32> to vector<2xf32>
    %113 = vector.shape_cast %112 : vector<2xf32> to vector<2x1xf32>
    %114 = vector.broadcast %113 : vector<2x1xf32> to vector<2x64xf32>
    %115 = arith.subf %111, %114 : vector<2x64xf32>
    %116 = math.exp %115 : vector<2x64xf32>
    %cst_48 = arith.constant dense<0.000000e+00> : vector<2xf32>
    %117 = vector.multi_reduction <add>, %116, %cst_48 [1] : vector<2x64xf32> to vector<2xf32>
    %118 = vector.shape_cast %117 : vector<2xf32> to vector<2x1xf32>
    %119 = vector.broadcast %118 : vector<2x1xf32> to vector<2x64xf32>
    %120 = arith.divf %116, %119 : vector<2x64xf32>
    %c0_49 = arith.constant 0 : index
    %c0_50 = arith.constant 0 : index
    %121 = vector.load %arg8[%c0_49, %c0_50] : memref<2x64xf32, #tpu.memory_space<vmem>>, vector<2x64xf32>
    tpu.vector_store %arg8[%c0_49, %c0_50], %120 {strides = array<i32>} : memref<2x64xf32, #tpu.memory_space<vmem>>, vector<2x64xf32>,
    return
  }
}

</mosaic_0001>

<bundles_post_ra>
// kernel: tpu_custom_call.1
= control target key start
LH: loop header
LB: loop body
LE: loop exit
PB: predicated region body
PF: predicated region fallthrough
CT: control target
= control target key end

     0   :  { %13 = vsyncpa [#allocation3], 0  ;;  %s932_s0 = inlined_call_operand.hbm [shape: f32[2,4,64], index: 0, kind: input, shape index: {}]   ;;  %s933_s1 = inlined_call_operand.vmem [shape: f32[2,4], index: 1, kind: input, shape index: {}]   ;;  %s934_s2 = inlined_call_operand.vmem [shape: f32[2], index: 2, kind: input, shape index: {}]   ;;  %s935_s3 = inlined_call_operand.vmem [shape: f32[2], index: 3, kind: input, shape index: {}]   ;;  %s936_s4 = inlined_call_operand.vmem [shape: f32[2], index: 4, kind: input, shape index: {}]   ;;  %s937_s5 = inlined_call_operand.hbm [shape: f32[64,64], index: 5, kind: input, shape index: {}]   ;;  %s938_s6 = inlined_call_operand.hbm [shape: f32[64,64], index: 6, kind: input, shape index: {}]   ;;  %s939_s7 = inlined_call_operand.vmem [shape: f32[1,64], index: 7, kind: input, shape index: {}]   ;;  %s940_s8 = inlined_call_operand.hbm [shape: f32[2,64], index: 8, kind: output, shape index: {}]  }
   0x1   :  { %14 = vsyncpa [#allocation5], 0 }
   0x2   :  { %15 = vsyncpa [#allocation8], 0 }
   0x3   :  { %16 = vsyncpa [#allocation11], 0 }
   0x4   :  { %17 = vsyncpa [#allocation13], 0  ;;  %s47_s29 = sshll.u32 %s934_s2, 4  ;;  %s48_s29 = int_to_ptr.vmem [resolvable:$true] %s47_s29 }
   0x5   :  { %18 = vsyncpa [#allocation4], 0  ;;  %s614_s30 = scalar_lea.vmem %s48_s29, 16  ;;  %p619_p1 = scmp.lt.s32.totalorder %s48_s29, %s48_s29 }
   0x6   :  { %p615_p0 = scmp.ne.s32.totalorder %s48_s29, %s614_s30  ;;  %p620_p2 = scmp.lt.s32.totalorder %s614_s30, %s614_s30 }
   0x8   :  { %p621_p3 = por %p620_p2, %p619_p1 }
   0xa   :  { %p622_p4 = pnand %p621_p3, %p615_p0 }
   0xc   :  { %625 = shalt.err (!%p622_p4)
}
   0xd   :  { %s762_s9 = smov [#allocation7]   ;;  %s763_s10 = smov [#allocation12]  }
   0xe   :  { %50 = dma.vmem_to_smem %s48_s29, 16, %s762_s9, [#allocation8]  }
   0xf   :  { %s76_s11 = sshll.u32 %s763_s10, 4  ;;  %s626_s14 = scalar_lea.hbm %s937_s5, 1024  ;;  %s77_s11 = int_to_ptr.vmem [resolvable:$true] %s76_s11 }
  0x10   :  { %p627_p5 = scmp.ne.s32.totalorder %s937_s5, %s626_s14  ;;  %p630_p6 = scmp.lt.u32.totalorder %s626_s14, %s937_s5 }
  0x12   :  { %p632_p7 = pnand %p630_p6, %p627_p5 }
  0x14   :  { %635 = shalt.err (!%p632_p7)
}
  0x15   :  { %s636_s18 = scalar_lea.vmem %s77_s11, 1024  ;;  %p641_p9 = scmp.lt.s32.totalorder %s77_s11, %s77_s11 }
  0x16   :  { %p637_p8 = scmp.ne.s32.totalorder %s77_s11, %s636_s18  ;;  %p642_p10 = scmp.lt.s32.totalorder %s636_s18, %s636_s18 }
  0x18   :  { %p643_p11 = por %p642_p10, %p641_p9 }
  0x1a   :  { %p644_p12 = pnand %p643_p11, %p637_p8 }
  0x1c   :  { %647 = shalt.err (!%p644_p12)
}
  0x1d   :  { %s764_s19 = smov 128   ;;  %s765_s20 = smov 8  }
  0x1e   :  { %82 = dma.hbm_to_vmem [thread:$0]  %s937_s5, 1024, %s77_s11, [#allocation13], %s764_s19, %s764_s19, %s765_s20  }
  0x1f   :  { %s766_s23 = smov [#allocation2]   ;;  %s37_s27 = sshll.u32 %s933_s1, 4  ;;  %s38_s27 = int_to_ptr.vmem [resolvable:$true] %s37_s27 }
  0x20   :  { %s24_s24 = sshll.u32 %s766_s23, 4  ;;  %s648_s30 = scalar_lea.hbm %s932_s0, 128  ;;  %s25_s24 = int_to_ptr.vmem [resolvable:$true] %s24_s24 }
  0x21   :  { %p649_p13 = scmp.ne.s32.totalorder %s932_s0, %s648_s30  ;;  %p652_p0 = scmp.lt.u32.totalorder %s648_s30, %s932_s0 }
  0x23   :  { %p654_p1 = pnand %p652_p0, %p649_p13 }
  0x25   :  { %657 = shalt.err (!%p654_p1)
}
  0x26   :  { %s658_s5 = scalar_lea.vmem %s25_s24, 128  ;;  %p663_p3 = scmp.lt.s32.totalorder %s25_s24, %s25_s24 }
  0x27   :  { %p659_p2 = scmp.ne.s32.totalorder %s25_s24, %s658_s5  ;;  %p664_p4 = scmp.lt.s32.totalorder %s658_s5, %s658_s5 }
  0x29   :  { %p665_p5 = por %p664_p4, %p663_p3 }
  0x2b   :  { %p666_p6 = pnand %p665_p5, %p659_p2 }
  0x2d   :  { %669 = shalt.err (!%p666_p6)
}
  0x2e   :  { %s767_s1 = smov 64   ;;  %s768_s11 = smov 4  }
  0x2f   :  { %30 = dma.hbm_to_vmem [thread:$0]  %s932_s0, 128, %s25_s24, [#allocation3], %s767_s1, %s767_s1, %s768_s11  }
  0x30   :  { %s670_s2 = scalar_lea.vmem %s38_s27, 32  ;;  %p675_p8 = scmp.lt.s32.totalorder %s38_s27, %s38_s27 }
  0x31   :  { %p671_p7 = scmp.ne.s32.totalorder %s38_s27, %s670_s2  ;;  %p676_p9 = scmp.lt.s32.totalorder %s670_s2, %s670_s2 }
  0x33   :  { %p677_p10 = por %p676_p9, %p675_p8 }
  0x35   :  { %p678_p11 = pnand %p677_p10, %p671_p7 }
  0x37   :  { %681 = shalt.err (!%p678_p11)
}
  0x38   :  { %s769_s16 = smov [#allocation6]   ;;  %s57_s21 = sshll.u32 %s935_s3, 4  ;;  %s58_s21 = int_to_ptr.vmem [resolvable:$true] %s57_s21 }
  0x39   :  { %40 = dma.vmem_to_smem %s38_s27, 32, %s769_s16, [#allocation5]  }
  0x3a   :  { %s67_s25 = sshll.u32 %s936_s4, 4  ;;  %s682_s0 = scalar_lea.vmem %s58_s21, 16  ;;  %s68_s25 = int_to_ptr.vmem [resolvable:$true] %s67_s25 }
  0x3b   :  { %p683_p12 = scmp.ne.s32.totalorder %s58_s21, %s682_s0  ;;  %p687_p13 = scmp.lt.s32.totalorder %s58_s21, %s58_s21 }
  0x3c   :  { %p688_p0 = scmp.lt.s32.totalorder %s682_s0, %s682_s0 }
  0x3e   :  { %p689_p1 = por %p688_p0, %p687_p13 }
  0x40   :  { %p690_p2 = pnand %p689_p1, %p683_p12 }
  0x42   :  { %693 = shalt.err (!%p690_p2)
}
  0x43   :  { %s770_s24 = smov [#allocation9]   ;;  %s694_s26 = scalar_lea.vmem %s68_s25, 16 }
  0x44   :  { %60 = dma.vmem_to_smem %s58_s21, 16, %s770_s24, [#allocation8]  }
  0x45   :  { %p695_p3 = scmp.ne.s32.totalorder %s68_s25, %s694_s26  ;;  %p699_p4 = scmp.lt.s32.totalorder %s68_s25, %s68_s25 }
  0x46   :  { %p700_p5 = scmp.lt.s32.totalorder %s694_s26, %s694_s26 }
  0x48   :  { %p701_p6 = por %p700_p5, %p699_p4 }
  0x4a   :  { %p702_p7 = pnand %p701_p6, %p695_p3 }
  0x4c   :  { %705 = shalt.err (!%p702_p7)
}
  0x4d   :  { %s771_s3 = smov [#allocation10]   ;;  %s772_s4 = smov [#allocation14]  }
  0x4e   :  { %70 = dma.vmem_to_smem %s68_s25, 16, %s771_s3, [#allocation11]  }
  0x4f   :  { %s88_s27 = sshll.u32 %s772_s4, 4  ;;  %s706_s30 = scalar_lea.hbm %s938_s6, 1024  ;;  %s89_s27 = int_to_ptr.vmem [resolvable:$true] %s88_s27 }
  0x50   :  { %p707_p8 = scmp.ne.s32.totalorder %s938_s6, %s706_s30  ;;  %p710_p9 = scmp.lt.u32.totalorder %s706_s30, %s938_s6 }
  0x52   :  { %p712_p10 = pnand %p710_p9, %p707_p8 }
  0x54   :  { %715 = shalt.err (!%p712_p10)
}
  0x55   :  { %s716_s5 = scalar_lea.vmem %s89_s27, 1024  ;;  %p721_p12 = scmp.lt.s32.totalorder %s89_s27, %s89_s27 }
  0x56   :  { %p717_p11 = scmp.ne.s32.totalorder %s89_s27, %s716_s5  ;;  %p722_p13 = scmp.lt.s32.totalorder %s716_s5, %s716_s5 }
  0x58   :  { %p723_p0 = por %p722_p13, %p721_p12 }
  0x5a   :  { %p724_p1 = pnand %p723_p0, %p717_p11 }
  0x5c   :  { %727 = shalt.err (!%p724_p1)
}
  0x5d   :  { %94 = dma.hbm_to_vmem [thread:$0]  %s938_s6, 1024, %s89_s27, [#allocation13], %s764_s19, %s764_s19, %s765_s20  }
  0x5e   :  { %750 = dma.done.wait [#allocation3], 128  }
  0x5f   :  { %751 = vsyncadd [#allocation3], 4294967168 }
  0x60   :  { %752 = dma.done.wait [#allocation5], 32  }
  0x61   :  { %753 = vsyncadd [#allocation5], 4294967264 }
  0x62   :  { %754 = dma.done.wait [#allocation8], 32  }
  0x63   :  { %755 = vsyncadd [#allocation8], 4294967264 }
  0x64   :  { %756 = dma.done.wait [#allocation11], 16  }
  0x65   :  { %757 = vsyncadd [#allocation11], 4294967280 }
  0x66   :  { %758 = dma.done.wait [#allocation13], 2048  }
  0x67   :  { %759 = vsyncadd [#allocation13], 4294965248 }
  0x68   :  { %118 = sfence }
  0x69   :  { %s127_s14 = sld [smem:[#allocation6]]  ;;  %s490_s15 = sld [smem:[#allocation6 + $0x1]]  ;;  %v119_v0 = vld [vmem:[#allocation2] sm:$0x1]  ;;  %v120_v1 = vld [vmem:[#allocation2 + $0x4] sm:$0x1] }
  0x6a   :  { %s491_s2 = sld [smem:[#allocation6 + $0x2]]  ;;  %s492_s16 = sld [smem:[#allocation6 + $0x3]]  ;;  %v121_v2 = vld [vmem:[#allocation2 + $0x1] sm:$0x1]  ;;  %v122_v3 = vld [vmem:[#allocation2 + $0x5] sm:$0x1] }
  0x6b   :  { %v123_v4 = vld [vmem:[#allocation2 + $0x2] sm:$0x1]  ;;  %v124_v5 = vld [vmem:[#allocation2 + $0x6] sm:$0x1]  ;;  %s149_s6 = sld [smem:[#allocation7]]  ;;  %vm156_vm0 = vcmask 1041409  }
  0x6c   :  { %v125_v7 = vld [vmem:[#allocation2 + $0x3] sm:$0x1]  ;;  %v126_v8 = vld [vmem:[#allocation2 + $0x7] sm:$0x1]  ;;  %vm159_vm1 = vcmask 517120   ;;  %s493_s19 = sld [smem:[#allocation6 + $0x80]] }
  0x6d   :  { %s494_s20 = sld [smem:[#allocation6 + $0x81]]  ;;  %s495_s17 = sld [smem:[#allocation6 + $0x82]]  ;;  %vm774_vm2 = vmmov 0   ;;  %vm302_vm3 = vcmask 523264  }
  0x6e   :  { %s496_s18 = sld [smem:[#allocation6 + $0x83]]  ;;  %s497_s21 = sld [smem:[#allocation7 + $0x1]] }
  0x6f   :  { %v128_v6 = vstv %s127_s14  ;;  %v132_v11 = vstv %s490_s15  ;;  %s194_s0 = sld [smem:[#allocation9]]  ;;  %s498_s3 = sld [smem:[#allocation9 + $0x1]] }
  0x70   :  { %v129_v9 = vmul.f32 %v128_v6, %v119_v0  ;;  %v130_v10 = vmul.f32 %v128_v6, %v120_v1  ;;  %v138_v12 = vstv %s491_s2  ;;  %v133_v13 = vmul.f32 %v132_v11, %v121_v2  ;;  %s202_s24 = sld [smem:[#allocation10]]  ;;  %s499_s4 = sld [smem:[#allocation10 + $0x1]] }
  0x71   :  { %v134_v14 = vmul.f32 %v132_v11, %v122_v3  ;;  %v139_v15 = vmul.f32 %v138_v12, %v123_v4  ;;  %v140_v16 = vmul.f32 %v138_v12, %v124_v5  ;;  %v144_v17 = vstv %s492_s16  ;;  %v284_v12 = vld [vmem:[#allocation12 + $0x10] sm:$0xff]  ;;  %s776_s29 = smov [#allocation15]  }
  0x72   :  { %v135_v18 = vadd.f32 %v133_v13, %v129_v9  ;;  %v145_v20 = vmul.f32 %v144_v17, %v125_v7  ;;  %v146_v21 = vmul.f32 %v144_v17, %v126_v8  ;;  %v150_v24 = vstv %s149_s6  ;;  %v283_v9 = vld [vmem:[#allocation12 + $0x8] sm:$0xff]  ;;  %v285_v13 = vld [vmem:[#allocation12 + $0x18] sm:$0xff]  ;;  %s477_s30 = sshll.u32 %s776_s29, 4  ;;  %s478_s30 = int_to_ptr.vmem [resolvable:$true] %s477_s30 }
  0x73   :  { %v136_v19 = vadd.f32 %v134_v14, %v130_v10  ;;  %v207_v32 = vstv %s493_s19  ;;  %v211_v33 = vstv %s494_s20  ;;  %v217_v36 = vstv %s495_s17  ;;  %p733_p3 = scmp.lt.s32.totalorder %s478_s30, %s478_s30 }
  0x74   :  { %v141_v22 = vadd.f32 %v139_v15, %v135_v18  ;;  %v209_v34 = vmul.f32 %v207_v32, %v120_v1  ;;  %v213_v35 = vmul.f32 %v211_v33, %v122_v3  ;;  %v208_v37 = vmul.f32 %v207_v32, %v119_v0  ;;  %v286_v15 = vld [vmem:[#allocation12 + $0x20] sm:$0xff] }
  0x75   :  { %v142_v23 = vadd.f32 %v140_v16, %v136_v19  ;;  %v212_v38 = vmul.f32 %v211_v33, %v121_v2  ;;  %v219_v40 = vmul.f32 %v217_v36, %v124_v5  ;;  %v223_v41 = vstv %s496_s18  ;;  %v287_v16 = vld [vmem:[#allocation12 + $0x28] sm:$0xff]  ;;  %v288_v19 = vld [vmem:[#allocation12 + $0x30] sm:$0xff] }
  0x76   :  { %v147_v25 = vadd.f32 %v145_v20, %v141_v22  ;;  %v215_v39 = vadd.f32 %v213_v35, %v209_v34  ;;  %v218_v43 = vmul.f32 %v217_v36, %v123_v4  ;;  %v225_v45 = vmul.f32 %v223_v41, %v126_v8  ;;  %v282_v8 = vld [vmem:[#allocation12] sm:$0xff]  ;;  %v289_v20 = vld [vmem:[#allocation12 + $0x38] sm:$0xff] }
  0x77   :  { %v148_v26 = vadd.f32 %v146_v21, %v142_v23  ;;  %v214_v42 = vadd.f32 %v212_v38, %v208_v37  ;;  %v224_v47 = vmul.f32 %v223_v41, %v125_v7  ;;  %v229_v49 = vstv %s497_s21 }
  0x78   :  { %v151_v27 = vadd.f32 %v150_v24, %v147_v25  ;;  %v221_v44 = vadd.f32 %v219_v40, %v215_v39  ;;  %v572_v10 = vpack.c.bf16 %v283_v9, %v282_v8  ;;  %v773_v11 = vmov 0.0|0.0  }
  0x79   :  { %v152_v28 = vadd.f32 %v150_v24, %v148_v26  ;;  %v220_v46 = vadd.f32 %v218_v43, %v214_v42  ;;  %571 = vmatprep.subr.bf16.mxu1 %v773_v11  ;;  %559 = vmatprep.subr.bf16.mxu0 %v773_v11  ;;  %v575_v14 = vpack.c.bf16 %v285_v13, %v284_v12  ;;  %v775_v18 = vmov 0.0  }
  0x7a   :  { %v227_v48 = vadd.f32 %v225_v45, %v221_v44  ;;  %573 = vmatpush3.bf16.msra.mxu1 %v572_v10  ;;  %v578_v17 = vpack.c.bf16 %v287_v16, %v286_v15  ;;  %556 = vmatprep.mubr.msk.f32.mxu1 %vm774_vm2, %v775_v18  ;;  %v581_v21 = vpack.c.bf16 %v289_v20, %v288_v19 }
  0x7b   :  { %v155_v29 = vrot.slane %v152_v28, 7  ;;  %v226_v50 = vadd.f32 %v224_v47, %v220_v46  ;;  %574 = vmatprep.subr.bf16.mxu1 %v773_v11  ;;  %537 = vmatprep.mubr.msk.f32.mxu0 %vm774_vm2, %v775_v18  ;;  %v195_v47 = vstv %s194_s0 }
  0x7c   :  { %v878_v51 = vadd.f32 %v229_v49, %v227_v48 }
  0x7d   :  { %v157_v30 = vsel %vm156_vm0, %v155_v29, %v151_v27  ;;  %v880_v52 = vadd.f32 %v229_v49, %v226_v50 }
  0x7e   :  { %v160_v31 = vsel %vm159_vm1, %v157_v30, 0.0  ;;  %v234_v53 = vrot.slane %v878_v51, 7  ;;  %576 = vmatpush3.bf16.msra.mxu1 %v575_v14 }
  0x7f   :  { %161 = vadd.xlane.f32.xlu0 %v160_v31  ;;  %577 = vmatprep.subr.bf16.mxu1 %v773_v11 }
  0x80   :  { %v235_v54 = vsel %vm156_vm0, %v234_v53, %v880_v52 }
  0x81   :  { %v237_v55 = vsel %vm159_vm1, %v235_v54, 0.0  ;;  %v203_v54 = vstv %s202_s24 }
  0x82   :  { %238 = vadd.xlane.f32.xlu1 %v237_v55  ;;  %579 = vmatpush3.bf16.msra.mxu1 %v578_v17 }
  0x83   :  { %580 = vmatprep.subr.bf16.mxu1 %v773_v11 }
  0x86   :  { %582 = vmatpush3.bf16.msra.mxu1 %v581_v21  ;;  %v279_v21 = vstv %s499_s4 }
 0x10c   :  { %v162_v56 = vpop.xlane.xlu0 %161 }
 0x10d   :  { %v163_v57 = vrot.slane %v162_v56, 4 }
 0x10f   :  { %v164_v58 = vadd.f32 %v163_v57, %v162_v56  ;;  %v239_v22 = vpop.xlane.xlu1 %238 }
 0x110   :  { %v240_v23 = vrot.slane %v239_v22, 4 }
 0x111   :  { %v165_v59 = vrot.slane %v164_v58, 2 }
 0x112   :  { %v241_v24 = vadd.f32 %v240_v23, %v239_v22 }
 0x113   :  { %v166_v60 = vadd.f32 %v165_v59, %v164_v58  ;;  %v290_v59 = vld [vmem:[#allocation14] sm:$0xff] }
 0x114   :  { %v242_v25 = vrot.slane %v241_v24, 2 }
 0x115   :  { %v167_v61 = vrot.slane %v166_v60, 1 }
 0x116   :  { %v243_v29 = vadd.f32 %v242_v25, %v241_v24 }
 0x117   :  { %v168_v62 = vadd.f32 %v167_v61, %v166_v60  ;;  %v291_v60 = vld [vmem:[#allocation14 + $0x8] sm:$0xff]  ;;  %v292_v61 = vld [vmem:[#allocation14 + $0x10] sm:$0xff] }
 0x118   :  { %v244_v32 = vrot.slane %v243_v29, 1 }
 0x119   :  { %583 = vpush %v168_v62  ;;  %v560_v62 = vpack.c.bf16 %v291_v60, %v290_v59 }
 0x11a   :  { %v245_v35 = vadd.f32 %v244_v32, %v243_v29 }
 0x11b   :  { %561 = vmatpush3.bf16.msra.mxu0 %v560_v62 }
 0x11c   :  { %562 = vmatprep.subr.bf16.mxu0 %v773_v11 }
 0x14a   :  { %s584_s22 = spop %583 }
 0x14b   :  { %v170_v63 = vstv %s584_s22 }
 0x14c   :  { %v172_v0 = vmul.f32 0.0078125, %v170_v63  ;;  %v293_v63 = vld [vmem:[#allocation14 + $0x18] sm:$0xff] }
 0x14e   :  { %v886_v1 = vsub.f32 %v151_v27, %v172_v0  ;;  %v888_v2 = vsub.f32 %v152_v28, %v172_v0  ;;  %v563_v0 = vpack.c.bf16 %v293_v63, %v292_v61 }
 0x150   :  { %v176_v3 = vmul.f32 %v888_v2, %v888_v2  ;;  %v175_v4 = vmul.f32 %v886_v1, %v886_v1  ;;  %v196_v49 = vmul.f32 %v195_v47, %v886_v1  ;;  %v197_v50 = vmul.f32 %v195_v47, %v888_v2  ;;  %v294_v1 = vld [vmem:[#allocation14 + $0x20] sm:$0xff]  ;;  %v295_v2 = vld [vmem:[#allocation14 + $0x28] sm:$0xff]  ;;  %564 = vmatpush3.bf16.msra.mxu0 %v563_v0 }
 0x151   :  { %565 = vmatprep.subr.bf16.mxu0 %v773_v11 }
 0x152   :  { %v179_v5 = vrot.slane %v176_v3, 7  ;;  %v566_v3 = vpack.c.bf16 %v295_v2, %v294_v1 }
 0x154   :  { %v180_v6 = vsel %vm156_vm0, %v179_v5, %v175_v4  ;;  %567 = vmatpush3.bf16.msra.mxu0 %v566_v3  ;;  %v296_v4 = vld [vmem:[#allocation14 + $0x30] sm:$0xff]  ;;  %v297_v5 = vld [vmem:[#allocation14 + $0x38] sm:$0xff] }
 0x155   :  { %v182_v7 = vsel %vm159_vm1, %v180_v6, 0.0  ;;  %568 = vmatprep.subr.bf16.mxu0 %v773_v11  ;;  %v569_v6 = vpack.c.bf16 %v297_v5, %v296_v4  ;;  %v271_v11 = vstv %s498_s3 }
 0x156   :  { %183 = vadd.xlane.f32.xlu0 %v182_v7 }
 0x158   :  { %570 = vmatpush3.bf16.msra.mxu0 %v569_v6 }
 0x1e3   :  { %v184_v26 = vpop.xlane.xlu0 %183 }
 0x1e4   :  { %v185_v27 = vrot.slane %v184_v26, 4 }
 0x1e6   :  { %v186_v28 = vadd.f32 %v185_v27, %v184_v26 }
 0x1e8   :  { %v187_v30 = vrot.slane %v186_v28, 2 }
 0x1ea   :  { %v188_v31 = vadd.f32 %v187_v30, %v186_v28 }
 0x1ec   :  { %v189_v33 = vrot.slane %v188_v31, 1 }
 0x1ee   :  { %v190_v34 = vadd.f32 %v189_v33, %v188_v31  ;;  %v502_v31 = vld [vmem:[%s939_s7] ss:$0 sm:$0xff]  ;;  %s728_s7 = scalar_lea.vmem %s478_s30, 32 }
 0x1ef   :  { %p729_p2 = scmp.ne.s32.totalorder %s478_s30, %s728_s7  ;;  %p734_p4 = scmp.lt.s32.totalorder %s728_s7, %s728_s7 }
 0x1f0   :  { %585 = vpush %v190_v34 }
 0x1f1   :  { %587 = vpush %v245_v35  ;;  %p735_p5 = por %p734_p4, %p733_p3 }
 0x1f3   :  { %p736_p6 = pnand %p735_p5, %p729_p2 }
 0x221   :  { %s586_s23 = spop %585 }
 0x222   :  { %v192_v36 = vstv %s586_s23  ;;  %s588_s25 = spop %587 }
 0x223   :  { %v193_v37 = vmul.f32 0.0078125, %v192_v36  ;;  %v247_v38 = vstv %s588_s25 }
 0x224   :  { %v248_v39 = vmul.f32 0.0078125, %v247_v38 }
 0x225   :  { %v198_v40 = vadd.f32 1e-05, %v193_v37 }
 0x226   :  { %v249_v41 = vsub.f32 %v880_v52, %v248_v39  ;;  %v250_v42 = vsub.f32 %v878_v51, %v248_v39 }
 0x227   :  { %606 = vrsqrt.f32 %v198_v40 }
 0x228   :  { %v252_v43 = vmul.f32 %v250_v42, %v250_v42  ;;  %v251_v44 = vmul.f32 %v249_v41, %v249_v41  ;;  %v272_v18 = vmul.f32 %v271_v11, %v249_v41  ;;  %v273_v19 = vmul.f32 %v271_v11, %v250_v42 }
 0x22a   :  { %v255_v45 = vrot.slane %v252_v43, 7 }
 0x22c   :  { %v256_v46 = vsel %vm156_vm0, %v255_v45, %v251_v44 }
 0x22d   :  { %v258_v48 = vsel %vm159_vm1, %v256_v46, 0.0 }
 0x22e   :  { %259 = vadd.xlane.f32.xlu1 %v258_v48 }
 0x231   :  { %v607_v53 = vpop.eup %606 }
 0x232   :  { %v200_v52 = vmul.f32 %v607_v53, %v196_v49  ;;  %v201_v55 = vmul.f32 %v607_v53, %v197_v50 }
 0x234   :  { %v205_v51 = vadd.f32 %v203_v54, %v201_v55  ;;  %v204_v56 = vadd.f32 %v203_v54, %v200_v52 }
 0x236   :  { %v377_v57 = vrot.slane %v205_v51, 7 }
 0x238   :  { %v378_v58 = vsel %vm156_vm0, %v377_v57, %v204_v56 }
 0x239   :  { %557 = vmatmul.mubr.msk.f32.vlgmr.msra.gmra.mrb[0].mxu1 %vm302_vm3, %v378_v58 }
 0x2bb   :  { %v260_v7 = vpop.xlane.xlu1 %259 }
 0x2bc   :  { %v261_v8 = vrot.slane %v260_v7, 4 }
 0x2be   :  { %v262_v9 = vadd.f32 %v261_v8, %v260_v7 }
 0x2c0   :  { %v263_v10 = vrot.slane %v262_v9, 2 }
 0x2c2   :  { %v264_v12 = vadd.f32 %v263_v10, %v262_v9 }
 0x2c4   :  { %v265_v13 = vrot.slane %v264_v12, 1 }
 0x2c6   :  { %v266_v14 = vadd.f32 %v265_v13, %v264_v12 }
 0x2c8   :  { %589 = vpush %v266_v14 }
 0x2f9   :  { %s590_s26 = spop %589 }
 0x2fa   :  { %v268_v15 = vstv %s590_s26 }
 0x2fb   :  { %v269_v16 = vmul.f32 0.0078125, %v268_v15 }
 0x2fd   :  { %v274_v17 = vadd.f32 1e-05, %v269_v16 }
 0x2ff   :  { %608 = vrsqrt.f32 %v274_v17 }
 0x309   :  { %v609_v20 = vpop.eup %608 }
 0x30a   :  { %v276_v22 = vmul.f32 %v609_v20, %v272_v18  ;;  %v277_v23 = vmul.f32 %v609_v20, %v273_v19 }
 0x30c   :  { %v447_v24 = vpop.f32.mrb[0].mxu1  ;;  %v281_v25 = vadd.f32 %v279_v21, %v277_v23  ;;  %v280_v27 = vadd.f32 %v279_v21, %v276_v22 }
 0x30d   :  { %v558_v26 = vpop.f32.mrb[1].mxu1 }
 0x30e   :  { %v300_v28 = vrot.slane %v281_v25, 7 }
 0x310   :  { %v301_v29 = vsel %vm156_vm0, %v300_v28, %v280_v27 }
 0x311   :  { %538 = vmatmul.mubr.msk.f32.vlgmr.msra.gmra.mrb[0].mxu0 %vm302_vm3, %v301_v29 }
 0x3e4   :  { %v371_v30 = vpop.f32.mrb[0].mxu0 }
 0x3e5   :  { %v448_v32 = vadd.f32 %v447_v24, %v371_v30  ;;  %v539_v33 = vpop.f32.mrb[1].mxu0 }
 0x3e7   :  { %v458_v34 = vadd.f32 %v502_v31, %v448_v32 }
 0x3e9   :  { %v459_v35 = vsel %vm159_vm1, %v458_v34, -inf }
 0x3ea   :  { %460 = vmax.xlane.f32.xlu0 %v459_v35 }
 0x477   :  { %v461_v36 = vpop.xlane.xlu0 %460 }
 0x478   :  { %v462_v37 = vsub.f32 %v458_v34, %v461_v36 }
 0x47a   :  { %v463_v38 = vmul.f32 1.442695, %v462_v37 }
 0x47c   :  { %610 = vpow2.f32 %v463_v38 }
 0x486   :  { %v611_v39 = vpop.eup %610 }
 0x487   :  { %v465_v40 = vsel %vm159_vm1, %v611_v39, 0.0 }
 0x488   :  { %466 = vadd.xlane.f32.xlu1 %v465_v40 }
 0x515   :  { %v467_v41 = vpop.xlane.xlu1 %466 }
 0x516   :  { %612 = vrcp.f32 %v467_v41 }
 0x520   :  { %v613_v42 = vpop.eup %612 }
 0x521   :  { %v469_v43 = vmul.f32 %v613_v42, %v611_v39 }
 0x523   :  { %470 = vst.msk [vmem:[#allocation15] sm:$0x3] %vm159_vm1, %v469_v43 }
 0x524   :  { %739 = shalt.err (!%p736_p6)
}
 0x525   :  { %s740_s12 = scalar_lea.hbm %s940_s8, 32 }
 0x526   :  { %p741_p7 = scmp.ne.s32.totalorder %s940_s8, %s740_s12  ;;  %p744_p8 = scmp.lt.u32.totalorder %s740_s12, %s940_s8 }
 0x528   :  { %p746_p9 = pnand %p744_p8, %p741_p7 }
 0x52a   :  { %749 = shalt.err (!%p746_p9)
}
 0x52b   :  { %480 = dma.vmem_to_hbm [thread:$0]  %s478_s30, 32, %s940_s8, [#allocation4]  }
 0x52c   :  { %760 = dma.done.wait [#allocation4], 32  }
 0x52d   :  { %761 = vsyncadd [#allocation4], 4294967264 }
 0x52e   :  { %484 = vsyncpa [#allocation3], 1 }
 0x52f   :  { %485 = vsyncpa [#allocation13], 1 }
 0x530   :  { %486 = vsyncpa [#allocation4], 1 }
 0x531   :  { %487 = vsyncpa [#allocation5], 1 }
 0x532   :  { %488 = vsyncpa [#allocation8], 1 }
 0x533   :  { %489 = vsyncpa [#allocation11], 1 }

</bundles_post_ra>
